<compile_context>
chip_gen: v7x
topology: tpu7x:2x2x1
jax: 0.10.0
libtpu: 0.0.40
codegen_flags: <defaults>
</compile_context>

<pallas_src>
import math
from functools import partial

import jax
import jax.numpy as jnp
from jax.experimental import pallas as pl
from jax.experimental.pallas import tpu as pltpu


def _round_up(x, m):
    return ((x + m - 1) // m) * m


# -----------------------------------------------------------------------------
# Kernels
# -----------------------------------------------------------------------------
def _con_gaussian_fused_kernel(x_ref, w_ref, b_ref, out_ref, *, n):
    """Fused lane-dense slab: cols [0,n) = mu branch, [n,2n) = sigma branch."""
    y = jnp.dot(x_ref[...], w_ref[...], preferred_element_type=jnp.float32)
    y = y + b_ref[...]                                  # (tm, Np) + (1, Np), f32
    col = jax.lax.broadcasted_iota(jnp.int32, y.shape, dimension=1)
    # Fold the two Hardtanh clips into a single clip after the branch select.
    z = jnp.where(col < n, y, jax.nn.softplus(y) + 1e-6)
    out_ref[...] = jnp.clip(z, 0.0, 1.0).astype(out_ref.dtype)


def _con_gaussian_split_kernel(x_ref, w_ref, b_ref, mu_ref, sig_ref, *, n):
    """N % 128 == 0: lane-aligned halves; softplus (EUP) only on the sigma half."""
    y = jnp.dot(x_ref[...], w_ref[...], preferred_element_type=jnp.float32)
    y = y + b_ref[...]
    mu_ref[...] = jnp.clip(y[:, :n], 0.0, 1.0).astype(mu_ref.dtype)
    sig = jax.nn.softplus(y[:, n:]) + 1e-6              # >= 1e-6, lower clip is a no-op
    sig_ref[...] = jnp.minimum(sig, 1.0).astype(sig_ref.dtype)


# -----------------------------------------------------------------------------
# pallas_call plumbing
# -----------------------------------------------------------------------------
def _pallas_forward(xp, W, b, *, tm, n, split, single_buffer_weights):
    Bp, K = xp.shape
    Np = W.shape[1]
    grid = (Bp // tm,)
    in_bytes = xp.dtype.itemsize

    wb_kwargs = {}
    if single_buffer_weights:
        # W / b block indices are constant across the grid; double-buffering them
        # is pure VMEM waste (matters for large K and for v7x's 64 MiB VMEM).
        wb_kwargs = dict(pipeline_mode=pl.Buffered(1))

    x_spec = pl.BlockSpec((tm, K), lambda i: (i, 0))
    w_spec = pl.BlockSpec((K, Np), lambda i: (0, 0), **wb_kwargs)   # resident weights
    b_spec = pl.BlockSpec((1, Np), lambda i: (0, 0), **wb_kwargs)

    if split:
        kernel = partial(_con_gaussian_split_kernel, n=n)
        out_shape = (jax.ShapeDtypeStruct((Bp, n), jnp.float32),
                     jax.ShapeDtypeStruct((Bp, n), jnp.float32))
        out_specs = [pl.BlockSpec((tm, n), lambda i: (i, 0)),
                     pl.BlockSpec((tm, n), lambda i: (i, 0))]
        transcendentals = 2 * Bp * n                    # exp + log, sigma half only
        out_bytes = 2 * 4 * Bp * n
    else:
        kernel = partial(_con_gaussian_fused_kernel, n=n)
        out_shape = jax.ShapeDtypeStruct((Bp, Np), jnp.float32)
        out_specs = pl.BlockSpec((tm, Np), lambda i: (i, 0))        # lane-dense stores
        transcendentals = 2 * Bp * Np
        out_bytes = 4 * Bp * Np

    cost = pl.CostEstimate(
        flops=2 * Bp * K * Np,
        transcendentals=transcendentals,
        bytes_accessed=in_bytes * (Bp * K + K * Np) + 4 * Np + out_bytes,
    )

    return pl.pallas_call(
        kernel,
        out_shape=out_shape,
        grid_spec=pl.GridSpec(
            grid=grid,
            in_specs=[x_spec, w_spec, b_spec],
            out_specs=out_specs,
        ),
        compiler_params=pltpu.CompilerParams(
            dimension_semantics=("parallel",)),
        cost_estimate=cost,
    )(xp, W, b)


def _choose_tm(B, tm_max):
    """Big batch tiles for the HBM roofline, but padding-aware, and >=2 grid
    steps for largish batches so megacore / v7x's 2 TensorCores both get work."""
    B8 = _round_up(B, 8)
    if B8 <= tm_max:
        if B8 >= 256:
            return _round_up((B8 + 1) // 2, 8)          # two parallel tiles
        return B8                                       # tiny batch: one tile
    best_tm, best_cost = None, None
    for c in (1024, 512, 256, 128, 64):
        if c > tm_max:
            continue
        Bp = _round_up(B, c)
        # padded rows cost real DMA/MXU/EUP; each grid step ~0.35 us overhead
        # (roughly a few dozen rows' worth) -> simple combined score.
        cost = Bp + 32 * (Bp // c)
        if best_cost is None or cost < best_cost:
            best_tm, best_cost = c, cost
    if best_tm is None:
        best_tm = max(8, (tm_max // 8) * 8)
    return best_tm


# -----------------------------------------------------------------------------
# Public API
# -----------------------------------------------------------------------------
def fuse_con_gaussian_params(w1, b1, w2, b2):
    """Fuse the two Linear heads into ONE lane-dense weight/bias.  Call once at
    init so the per-call path pays no concat/pad HBM pass."""
    n = w1.shape[1]
    W = jnp.concatenate([w1, w2], axis=1)                           # [K, 2N]
    b = jnp.concatenate([b1.reshape(1, -1), b2.reshape(1, -1)], axis=1)
    Np = max(128, _round_up(2 * n, 128))
    if Np != 2 * n:
        W = jnp.pad(W, ((0, 0), (0, Np - 2 * n)))
        b = jnp.pad(b, ((0, 0), (0, Np - 2 * n)))
    return W, b


def con_gaussian_layer(x, fused_w, fused_b, output_dim, *,
                       tm_max=512, compute_dtype=jnp.bfloat16):
    """ConGaussianLayer forward.  fused_w/fused_b from fuse_con_gaussian_params.
    Returns [mu, sig_pos], each [B, output_dim] float32."""
    B, K = x.shape
    N = output_dim
    Np = fused_w.shape[1]
    # N multiple of 128 -> lane-aligned heads: two lane-dense outputs and
    # softplus only on the sigma half.  Otherwise keep the fused 128-lane slab.
    split = (N % 128 == 0)

    tm = _choose_tm(B, tm_max)
    in_bytes = jnp.asarray(0, dtype=compute_dtype).dtype.itemsize
    # VMEM guard: x double-buffered + resident W/b + double-buffered outputs must
    # fit comfortably under the scoped default on every generation.
    while tm > 8 and (2 * tm * K * in_bytes + 2 * K * Np * in_bytes
                      + 2 * tm * Np * 4 + 2 * Np * 4) > (12 << 20):
        tm = max(8, _round_up(tm // 2, 8))

    Bp = _round_up(B, tm)
    xp = jnp.pad(x, ((0, Bp - B), (0, 0))) if Bp != B else x
    xp = xp.astype(compute_dtype)
    W = fused_w.astype(compute_dtype)
    b = fused_b.astype(jnp.float32)          # bias added in f32 after the MXU

    try:
        out = _pallas_forward(xp, W, b, tm=tm, n=N, split=split,
                              single_buffer_weights=True)
    except Exception:
        # pipeline_mode / pl.Buffered not supported by this JAX build:
        # fall back to default double-buffered weight blocks.
        out = _pallas_forward(xp, W, b, tm=tm, n=N, split=split,
                              single_buffer_weights=False)

    if split:
        mu, sig_pos = out
        if Bp != B:
            mu, sig_pos = mu[:B], sig_pos[:B]
        return [mu, sig_pos]
    fused = out
    return [fused[:B, :N], fused[:B, N:2 * N]]


def init_params(key, input_shape, output_dim):
    """Deterministic xavier_normal_ (gain=sqrt(2) for 'relu'), zero biases.
    Weights stored as [in, out] (transposed PyTorch layout) for the kernel."""
    gain = math.sqrt(2.0)
    std = gain * math.sqrt(2.0 / (input_shape + output_dim))
    k1, k2 = jax.random.split(key)
    w1 = std * jax.random.normal(k1, (input_shape, output_dim), jnp.float32)
    w2 = std * jax.random.normal(k2, (input_shape, output_dim), jnp.float32)
    b1 = jnp.zeros((1, output_dim), jnp.float32)
    b2 = jnp.zeros((1, output_dim), jnp.float32)
    return w1, b1, w2, b2


if __name__ == "__main__":
    def reference(x, w1, b1, w2, b2, cast=None):
        """Pure-JAX ConGaussianLayer forward (optionally with the same bf16
        input cast / f32 accumulate contract as the kernel)."""
        xx, ww1, ww2 = (x, w1, w2) if cast is None else (
            x.astype(cast), w1.astype(cast), w2.astype(cast))
        mu = jnp.clip(jnp.dot(xx, ww1, preferred_element_type=jnp.float32) + b1,
                      0.0, 1.0)
        s = jnp.dot(xx, ww2, preferred_element_type=jnp.float32) + b2
        sig = jnp.clip(jax.nn.softplus(s) + 1e-6, 0.0, 1.0)
        return mu, sig

    key = jax.random.PRNGKey(0)
    k1, k2, k3, k4 = jax.random.split(key, 4)

    # ---- case 1: output_dim = 64 (< 128) -> fused 128-lane slab path ----
    batch, input_shape, output_dim = 16, 32, 64
    x = jax.random.normal(k1, (batch, input_shape), jnp.float32)
    w1, b1, w2, b2 = init_params(k2, input_shape, output_dim)
    W, b = fuse_con_gaussian_params(w1, b1, w2, b2)      # fused once at init

    mu, sig_pos = con_gaussian_layer(x, W, b, output_dim)        # bf16 default
    jax.block_until_ready(mu)
    jax.block_until_ready(sig_pos)
    assert mu.shape == (batch, output_dim) and sig_pos.shape == (batch, output_dim)

    mu_bf, sig_bf = reference(x, w1, b1, w2, b2, cast=jnp.bfloat16)
    assert jnp.allclose(mu, mu_bf, atol=1e-3)
    assert jnp.allclose(sig_pos, sig_bf, atol=1e-3)
    mu_f32, sig_f32 = reference(x, w1, b1, w2, b2)
    assert jnp.allclose(mu, mu_f32, atol=1e-1)           # bf16-input vs f32 module
    assert jnp.allclose(sig_pos, sig_f32, atol=1e-1)

    # exact f32 semantics when requested
    mu_x, sig_x = con_gaussian_layer(x, W, b, output_dim, compute_dtype=jnp.float32)
    jax.block_until_ready(mu_x)
    assert jnp.allclose(mu_x, mu_f32, atol=1e-4)
    assert jnp.allclose(sig_x, sig_f32, atol=1e-4)

    # ---- case 2: output_dim = 128 (multiple of 128) -> split-output path ----
    batch2, input_shape2, output_dim2 = 40, 64, 128
    x2 = jax.random.normal(k3, (batch2, input_shape2), jnp.float32)
    params2 = init_params(k4, input_shape2, output_dim2)
    W2, bb2 = fuse_con_gaussian_params(*params2)
    mu2, sig2 = con_gaussian_layer(x2, W2, bb2, output_dim2)
    jax.block_until_ready(mu2)
    jax.block_until_ready(sig2)
    assert mu2.shape == (batch2, output_dim2) and sig2.shape == (batch2, output_dim2)
    mu2_bf, sig2_bf = reference(x2, *params2, cast=jnp.bfloat16)
    assert jnp.allclose(mu2, mu2_bf, atol=1e-3)
    assert jnp.allclose(sig2, sig2_bf, atol=1e-3)

    print("KERNEL_OK")
</pallas_src>

<mosaic_0001>
module attributes {stable_mosaic.version = 11 : i64} {
  func.func @_con_gaussian_fused_kernel(%arg0: i32, %arg1: memref<16x32xbf16, #tpu.memory_space<vmem>>, %arg2: memref<32x128xbf16, #tpu.memory_space<vmem>>, %arg3: memref<1x128xf32, #tpu.memory_space<vmem>>, %arg4: memref<16x128xf32, #tpu.memory_space<vmem>>) attributes {dimension_semantics = [#tpu.dimension_semantics<parallel>], iteration_bounds = array<i64: 1>, scalar_prefetch = 0 : i64, scratch_operands = 0 : i64, tpu.core_type = #tpu.core_type<tc>, window_params = [{transform_indices = @transform_0, window_bounds = array<i64: 16, 32>}, {pipeline_mode = #tpu.pipeline_mode<synchronous>, transform_indices = @transform_1, window_bounds = array<i64: 32, 128>}, {pipeline_mode = #tpu.pipeline_mode<synchronous>, transform_indices = @transform_2, window_bounds = array<i64: 1, 128>}, {transform_indices = @transform_3, window_bounds = array<i64: 16, 128>}]} {
    %c0 = arith.constant 0 : index
    %c0_0 = arith.constant 0 : index
    %0 = vector.load %arg1[%c0, %c0_0] : memref<16x32xbf16, #tpu.memory_space<vmem>>, vector<16x32xbf16>
    %c0_1 = arith.constant 0 : index
    %c0_2 = arith.constant 0 : index
    %1 = vector.load %arg2[%c0_1, %c0_2] : memref<32x128xbf16, #tpu.memory_space<vmem>>, vector<32x128xbf16>
    %cst = arith.constant dense<0.000000e+00> : vector<16x128xf32>
    %2 = tpu.matmul %0, %1, %cst {dimension_numbers = #tpu.dot_dimension_numbers<[1], [0], [0], [1], [0, 0, 1, 1], [], []>} : vector<16x32xbf16>, vector<32x128xbf16>, vector<16x128xf32> -> vector<16x128xf32>
    %c0_3 = arith.constant 0 : index
    %c0_4 = arith.constant 0 : index
    %3 = vector.load %arg3[%c0_3, %c0_4] : memref<1x128xf32, #tpu.memory_space<vmem>>, vector<1x128xf32>
    %4 = vector.broadcast %3 : vector<1x128xf32> to vector<16x128xf32>
    %5 = arith.addf %2, %4 : vector<16x128xf32>
    %6 = tpu.iota {dimensions = array<i32: 1>} : vector<16x128xi32>
    %c64_i32 = arith.constant 64 : i32
    %7 = vector.broadcast %c64_i32 : i32 to vector<16x128xi32>
    %8 = arith.cmpi slt, %6, %7 : vector<16x128xi32>
    %cst_5 = arith.constant 0.000000e+00 : f32
    %9 = vector.broadcast %cst_5 : f32 to vector<16x128xf32>
    %10 = arith.maximumf %5, %9 : vector<16x128xf32>
    %11 = vector.broadcast %cst_5 : f32 to vector<16x128xf32>
    %12 = arith.subf %5, %11 : vector<16x128xf32>
    %13 = arith.cmpf one, %12, %12 : vector<16x128xf32>
    %14 = vector.broadcast %cst_5 : f32 to vector<16x128xf32>
    %15 = arith.addf %5, %14 : vector<16x128xf32>
    %16 = math.absf %12 : vector<16x128xf32>
    %cst_6 = arith.constant 0.000000e+00 : f32
    %17 = vector.broadcast %cst_6 : f32 to vector<16x128xf32>
    %18 = arith.subf %17, %16 : vector<16x128xf32>
    %19 = math.exp %18 : vector<16x128xf32>
    %20 = math.log1p %19 : vector<16x128xf32>
    %21 = arith.addf %10, %20 : vector<16x128xf32>
    %22 = arith.select %13, %15, %21 : vector<16x128xi1>, vector<16x128xf32>
    %cst_7 = arith.constant 9.99999997E-7 : f32
    %23 = vector.broadcast %cst_7 : f32 to vector<16x128xf32>
    %24 = arith.addf %22, %23 : vector<16x128xf32>
    %25 = arith.select %8, %5, %24 : vector<16x128xi1>, vector<16x128xf32>
    %cst_8 = arith.constant 0.000000e+00 : f32
    %cst_9 = arith.constant 1.000000e+00 : f32
    %26 = vector.broadcast %cst_8 : f32 to vector<16x128xf32>
    %27 = arith.maximumf %26, %25 : vector<16x128xf32>
    %28 = vector.broadcast %cst_9 : f32 to vector<16x128xf32>
    %29 = arith.minimumf %28, %27 : vector<16x128xf32>
    %c0_10 = arith.constant 0 : index
    %c0_11 = arith.constant 0 : index
    %30 = vector.load %arg4[%c0_10, %c0_11] : memref<16x128xf32, #tpu.memory_space<vmem>>, vector<16x128xf32>
    tpu.vector_store %arg4[%c0_10, %c0_11], %29 {strides = array<i32>} : memref<16x128xf32, #tpu.memory_space<vmem>>, vector<16x128xf32>,
    return
  }
  func.func @transform_0(%arg0: i32) -> (i32, i32) {
    %c0_i32 = arith.constant 0 : i32
    %c0_i32_0 = arith.constant 0 : i32
    return %arg0, %c0_i32 : i32, i32
  }
  func.func @transform_1(%arg0: i32) -> (i32, i32) {
    %c0_i32 = arith.constant 0 : i32
    %c0_i32_0 = arith.constant 0 : i32
    %c0_i32_1 = arith.constant 0 : i32
    return %c0_i32, %c0_i32_0 : i32, i32
  }
  func.func @transform_2(%arg0: i32) -> (i32, i32) {
    %c0_i32 = arith.constant 0 : i32
    %c0_i32_0 = arith.constant 0 : i32
    %c0_i32_1 = arith.constant 0 : i32
    return %c0_i32, %c0_i32_0 : i32, i32
  }
  func.func @transform_3(%arg0: i32) -> (i32, i32) {
    %c0_i32 = arith.constant 0 : i32
    %c0_i32_0 = arith.constant 0 : i32
    return %arg0, %c0_i32 : i32, i32
  }
}

module attributes {stable_mosaic.version = 11 : i64} {
  func.func @_con_gaussian_fused_kernel(%arg0: i32, %arg1: memref<16x32xbf16, #tpu.memory_space<vmem>>, %arg2: memref<32x128xbf16, #tpu.memory_space<vmem>>, %arg3: memref<1x128xf32, #tpu.memory_space<vmem>>, %arg4: memref<16x128xf32, #tpu.memory_space<vmem>>) attributes {dimension_semantics = [#tpu.dimension_semantics<parallel>], iteration_bounds = array<i64: 1>, scalar_prefetch = 0 : i64, scratch_operands = 0 : i64, tpu.core_type = #tpu.core_type<tc>, window_params = [{transform_indices = @transform_0, window_bounds = array<i64: 16, 32>}, {pipeline_mode = #tpu.pipeline_mode<synchronous>, transform_indices = @transform_1, window_bounds = array<i64: 32, 128>}, {pipeline_mode = #tpu.pipeline_mode<synchronous>, transform_indices = @transform_2, window_bounds = array<i64: 1, 128>}, {transform_indices = @transform_3, window_bounds = array<i64: 16, 128>}]} {
    %c0 = arith.constant 0 : index
    %c0_0 = arith.constant 0 : index
    %0 = vector.load %arg1[%c0, %c0_0] : memref<16x32xbf16, #tpu.memory_space<vmem>>, vector<16x32xbf16>
    %c0_1 = arith.constant 0 : index
    %c0_2 = arith.constant 0 : index
    %1 = vector.load %arg2[%c0_1, %c0_2] : memref<32x128xbf16, #tpu.memory_space<vmem>>, vector<32x128xbf16>
    %cst = arith.constant dense<0.000000e+00> : vector<16x128xf32>
    %2 = tpu.matmul %0, %1, %cst {dimension_numbers = #tpu.dot_dimension_numbers<[1], [0], [0], [1], [0, 0, 1, 1], [], []>} : vector<16x32xbf16>, vector<32x128xbf16>, vector<16x128xf32> -> vector<16x128xf32>
    %c0_3 = arith.constant 0 : index
    %c0_4 = arith.constant 0 : index
    %3 = vector.load %arg3[%c0_3, %c0_4] : memref<1x128xf32, #tpu.memory_space<vmem>>, vector<1x128xf32>
    %4 = vector.broadcast %3 : vector<1x128xf32> to vector<16x128xf32>
    %5 = arith.addf %2, %4 : vector<16x128xf32>
    %6 = tpu.iota {dimensions = array<i32: 1>} : vector<16x128xi32>
    %c64_i32 = arith.constant 64 : i32
    %7 = vector.broadcast %c64_i32 : i32 to vector<16x128xi32>
    %8 = arith.cmpi slt, %6, %7 : vector<16x128xi32>
    %cst_5 = arith.constant 0.000000e+00 : f32
    %9 = vector.broadcast %cst_5 : f32 to vector<16x128xf32>
    %10 = arith.maximumf %5, %9 : vector<16x128xf32>
    %11 = vector.broadcast %cst_5 : f32 to vector<16x128xf32>
    %12 = arith.subf %5, %11 : vector<16x128xf32>
    %13 = arith.cmpf one, %12, %12 : vector<16x128xf32>
    %14 = vector.broadcast %cst_5 : f32 to vector<16x128xf32>
    %15 = arith.addf %5, %14 : vector<16x128xf32>
    %16 = math.absf %12 : vector<16x128xf32>
    %cst_6 = arith.constant 0.000000e+00 : f32
    %17 = vector.broadcast %cst_6 : f32 to vector<16x128xf32>
    %18 = arith.subf %17, %16 : vector<16x128xf32>
    %19 = math.exp %18 : vector<16x128xf32>
    %20 = math.log1p %19 : vector<16x128xf32>
    %21 = arith.addf %10, %20 : vector<16x128xf32>
    %22 = arith.select %13, %15, %21 : vector<16x128xi1>, vector<16x128xf32>
    %cst_7 = arith.constant 9.99999997E-7 : f32
    %23 = vector.broadcast %cst_7 : f32 to vector<16x128xf32>
    %24 = arith.addf %22, %23 : vector<16x128xf32>
    %25 = arith.select %8, %5, %24 : vector<16x128xi1>, vector<16x128xf32>
    %cst_8 = arith.constant 0.000000e+00 : f32
    %cst_9 = arith.constant 1.000000e+00 : f32
    %26 = vector.broadcast %cst_8 : f32 to vector<16x128xf32>
    %27 = arith.maximumf %26, %25 : vector<16x128xf32>
    %28 = vector.broadcast %cst_9 : f32 to vector<16x128xf32>
    %29 = arith.minimumf %28, %27 : vector<16x128xf32>
    %c0_10 = arith.constant 0 : index
    %c0_11 = arith.constant 0 : index
    %30 = vector.load %arg4[%c0_10, %c0_11] : memref<16x128xf32, #tpu.memory_space<vmem>>, vector<16x128xf32>
    tpu.vector_store %arg4[%c0_10, %c0_11], %29 {strides = array<i32>} : memref<16x128xf32, #tpu.memory_space<vmem>>, vector<16x128xf32>,
    return
  }
  func.func @transform_0(%arg0: i32) -> (i32, i32) {
    %c0_i32 = arith.constant 0 : i32
    %c0_i32_0 = arith.constant 0 : i32
    return %arg0, %c0_i32 : i32, i32
  }
  func.func @transform_1(%arg0: i32) -> (i32, i32) {
    %c0_i32 = arith.constant 0 : i32
    %c0_i32_0 = arith.constant 0 : i32
    %c0_i32_1 = arith.constant 0 : i32
    return %c0_i32, %c0_i32_0 : i32, i32
  }
  func.func @transform_2(%arg0: i32) -> (i32, i32) {
    %c0_i32 = arith.constant 0 : i32
    %c0_i32_0 = arith.constant 0 : i32
    %c0_i32_1 = arith.constant 0 : i32
    return %c0_i32, %c0_i32_0 : i32, i32
  }
  func.func @transform_3(%arg0: i32) -> (i32, i32) {
    %c0_i32 = arith.constant 0 : i32
    %c0_i32_0 = arith.constant 0 : i32
    return %arg0, %c0_i32 : i32, i32
  }
}

</mosaic_0001>

<bundles_post_ra>
// kernel: tpu_custom_call.1
= control target key start
LH: loop header
LB: loop body
LE: loop exit
PB: predicated region body
PF: predicated region fallthrough
CT: control target
= control target key end

     0   :  { %8 = vsyncpa [#allocation3], 0  ;;  %s362_s0 = inlined_call_operand.hbm [shape: bf16[16,32], index: 0, kind: input, shape index: {}]   ;;  %s363_s1 = inlined_call_operand.hbm [shape: bf16[32,128], index: 1, kind: input, shape index: {}]   ;;  %s364_s2 = inlined_call_operand.vmem [shape: f32[1,128], index: 2, kind: input, shape index: {}]   ;;  %s365_s3 = inlined_call_operand.hbm [shape: f32[16,128], index: 3, kind: output, shape index: {}]  }
   0x1   :  { %9 = vsyncpa [#allocation6], 0 }
   0x2   :  { %10 = vsyncpa [#allocation4], 0  ;;  %s294_s12 = smov [#allocation2]   ;;  %s222_s16 = scalar_lea.hbm %s362_s0, 128 }
   0x3   :  { %s16_s13 = sshll.u32 %s294_s12, 4  ;;  %p223_p0 = scmp.ne.s32.totalorder %s362_s0, %s222_s16  ;;  %s17_s13 = int_to_ptr.vmem [resolvable:$true] %s16_s13 }
   0x4   :  { %p226_p1 = scmp.lt.u32.totalorder %s222_s16, %s362_s0 }
   0x6   :  { %p228_p2 = pnand %p226_p1, %p223_p0 }
   0x8   :  { %231 = shalt.err (!%p228_p2)
}
   0x9   :  { %s232_s21 = scalar_lea.vmem %s17_s13, 128  ;;  %p237_p4 = scmp.lt.s32.totalorder %s17_s13, %s17_s13 }
   0xa   :  { %p233_p3 = scmp.ne.s32.totalorder %s17_s13, %s232_s21  ;;  %p238_p5 = scmp.lt.s32.totalorder %s232_s21, %s232_s21 }
   0xc   :  { %p239_p6 = por %p238_p5, %p237_p4 }
   0xe   :  { %p240_p7 = pnand %p239_p6, %p233_p3 }
  0x10   :  { %243 = shalt.err (!%p240_p7)
}
  0x11   :  { %s295_s22 = smov 64   ;;  %s296_s23 = smov 4  }
  0x12   :  { %22 = dma.hbm_to_vmem [thread:$0]  %s362_s0, 128, %s17_s13, [#allocation3], %s295_s22, %s295_s22, %s296_s23  }
  0x13   :  { %s297_s26 = smov [#allocation5]   ;;  %s244_s30 = scalar_lea.hbm %s363_s1, 256 }
  0x14   :  { %s28_s27 = sshll.u32 %s297_s26, 4  ;;  %p245_p8 = scmp.ne.s32.totalorder %s363_s1, %s244_s30  ;;  %s29_s27 = int_to_ptr.vmem [resolvable:$true] %s28_s27 }
  0x15   :  { %p248_p9 = scmp.lt.u32.totalorder %s244_s30, %s363_s1 }
  0x17   :  { %p250_p10 = pnand %p248_p9, %p245_p8 }
  0x19   :  { %253 = shalt.err (!%p250_p10)
}
  0x1a   :  { %s254_s8 = scalar_lea.vmem %s29_s27, 256  ;;  %p259_p12 = scmp.lt.s32.totalorder %s29_s27, %s29_s27 }
  0x1b   :  { %p255_p11 = scmp.ne.s32.totalorder %s29_s27, %s254_s8  ;;  %p260_p13 = scmp.lt.s32.totalorder %s254_s8, %s254_s8 }
  0x1d   :  { %p261_p0 = por %p260_p13, %p259_p12 }
  0x1f   :  { %p262_p1 = pnand %p261_p0, %p255_p11 }
  0x21   :  { %265 = shalt.err (!%p262_p1)
}
  0x22   :  { %34 = dma.hbm_to_vmem [thread:$0]  %s363_s1, 256, %s29_s27, [#allocation6], %s295_s22, %s295_s22, %s296_s23  }
  0x23   :  { %288 = dma.done.wait [#allocation3], 128  }
  0x24   :  { %289 = vsyncadd [#allocation3], 4294967168 }
  0x25   :  { %290 = dma.done.wait [#allocation6], 256  }
  0x26   :  { %291 = vsyncadd [#allocation6], 4294967040  ;;  %v298_v0 = vmov 0.0   ;;  %vm299_vm0 = vmmov 0   ;;  %v211_v1 = vld [vmem:[#allocation5] sm:$0xff]   ;;  %v212_v2 = vld [vmem:[#allocation5 + $0x8] sm:$0xff]   ;;  %v119_v25 = vlaneseq }
  0x27   :  { %194 = vmatprep.subr.bf16.mxu0 %v298_v0  ;;  %198 = vmatprep.mubr.msk.bf16.mxu0 %vm299_vm0, %v298_v0  ;;  %v213_v3 = vld [vmem:[#allocation2] sm:$0xff]   ;;  %vm74_vm1 = vcmask 261120   ;;  %s300_s1 = smov [#allocation7]  }
  0x28   :  { %195 = vmatpush3.bf16.msra.mxu0 %v211_v1  ;;  %v186_v4 = vld [vmem:[%s364_s2] ss:$0 sm:$0xff]  ;;  %v120_v33 = vand.u32 127, %v119_v25  ;;  %s173_s2 = sshll.u32 %s300_s1, 4  ;;  %s174_s2 = int_to_ptr.vmem [resolvable:$true] %s173_s2 }
  0x29   :  { %196 = vmatprep.subr.bf16.mxu0 %v298_v0  ;;  %s266_s12 = scalar_lea.vmem %s174_s2, 256  ;;  %p271_p3 = scmp.lt.s32.totalorder %s174_s2, %s174_s2 }
  0x2a   :  { %vm121_vm5 = vcmp.lt.s32.totalorder %v120_v33, 64  ;;  %p267_p2 = scmp.ne.s32.totalorder %s174_s2, %s266_s12  ;;  %p272_p4 = scmp.lt.s32.totalorder %s266_s12, %s266_s12 }
  0x2c   :  { %197 = vmatpush3.bf16.msra.mxu0 %v212_v2  ;;  %p273_p5 = por %p272_p4, %p271_p3 }
  0x2e   :  { %p274_p6 = pnand %p273_p5, %p267_p2 }
  0x2f   :  { %199 = vmatmul.mubr.msk.bf16.vlgmr.msra.gmra.mrb[0].mxu0 %vm74_vm1, %v213_v3 }
 0x102   :  { %v112_v5 = vpop.f32.mrb[0].mxu0 }
 0x103   :  { %v113_v6 = vadd.f32 %v186_v4, %v112_v5  ;;  %v200_v7 = vpop.f32.mrb[1].mxu0 }
 0x104   :  { %v115_v8 = vpop.f32.mrb[2].mxu0 }
 0x105   :  { %v128_v9 = vand.u32 2147483647, %v113_v6  ;;  %v116_v10 = vadd.f32 %v186_v4, %v115_v8  ;;  %v201_v11 = vpop.f32.mrb[3].mxu0  ;;  %v122_v32 = vmax.f32 %v113_v6, 0.0  ;;  %vm124_vm4 = vcmp.ne.f32.partialorder %v113_v6, %v113_v6 }
 0x107   :  { %v130_v12 = vsub.f32 0.0, %v128_v9  ;;  %v129_v13 = vand.u32 2147483647, %v116_v10  ;;  %v123_v38 = vmax.f32 %v116_v10, 0.0  ;;  %vm125_vm6 = vcmp.ne.f32.partialorder %v116_v10, %v116_v10 }
 0x109   :  { %v132_v14 = vmul.f32 1.442695, %v130_v12  ;;  %v131_v15 = vsub.f32 0.0, %v129_v13 }
 0x10b   :  { %214 = vpow2.f32 %v132_v14  ;;  %v134_v16 = vmul.f32 1.442695, %v131_v15 }
 0x10d   :  { %216 = vpow2.f32 %v134_v16 }
 0x115   :  { %v215_v17 = vpop.eup %214 }
 0x116   :  { %v136_v18 = vadd.f32 1.0, %v215_v17  ;;  %v139_v21 = vmul.f32 -0.5, %v215_v17  ;;  %v142_v24 = vand.u32 2147483647, %v215_v17 }
 0x117   :  { %v217_v19 = vpop.eup %216 }
 0x118   :  { %218 = vlog2.f32 %v136_v18  ;;  %v145_v20 = vadd.f32 1.0, %v217_v19  ;;  %v148_v22 = vmul.f32 -0.5, %v217_v19  ;;  %v140_v23 = vadd.f32 1.0, %v139_v21 }
 0x119   :  { %v151_v28 = vand.u32 2147483647, %v217_v19  ;;  %vm143_vm2 = vcmp.lt.f32.partialorder %v142_v24, 0.0004427343 }
 0x11a   :  { %220 = vlog2.f32 %v145_v20  ;;  %v149_v26 = vadd.f32 1.0, %v148_v22  ;;  %v141_v30 = vmul.f32 %v215_v17, %v140_v23 }
 0x11b   :  { %vm152_vm3 = vcmp.lt.f32.partialorder %v151_v28, 0.0004427343 }
 0x11c   :  { %v150_v36 = vmul.f32 %v217_v19, %v149_v26 }
 0x122   :  { %v219_v27 = vpop.eup %218 }
 0x123   :  { %v138_v29 = vmul.f32 0.6931472, %v219_v27 }
 0x124   :  { %v221_v31 = vpop.eup %220 }
 0x125   :  { %v144_v34 = vsel %vm143_vm2, %v141_v30, %v138_v29  ;;  %v147_v35 = vmul.f32 0.6931472, %v221_v31 }
 0x126   :  { %v154_v37 = vadd.f32 %v144_v34, %v122_v32 }
 0x127   :  { %v153_v39 = vsel %vm152_vm3, %v150_v36, %v147_v35 }
 0x128   :  { %v156_v40 = vsel %vm124_vm4, %v113_v6, %v154_v37  ;;  %v155_v41 = vadd.f32 %v153_v39, %v123_v38 }
 0x129   :  { %v158_v42 = vadd.f32 1e-06, %v156_v40 }
 0x12a   :  { %v157_v43 = vsel %vm125_vm6, %v116_v10, %v155_v41 }
 0x12b   :  { %v159_v44 = vadd.f32 1e-06, %v157_v43  ;;  %v160_v45 = vsel %vm121_vm5, %v113_v6, %v158_v42 }
 0x12c   :  { %v162_v46 = vmax.f32 %v160_v45, 0.0 }
 0x12d   :  { %v161_v47 = vsel %vm121_vm5, %v116_v10, %v159_v44 }
 0x12e   :  { %v163_v48 = vmax.f32 %v161_v47, 0.0  ;;  %v164_v49 = vmin.f32 %v162_v46, 1.0 }
 0x130   :  { %v165_v50 = vmin.f32 %v163_v48, 1.0  ;;  %166 = vst [vmem:[#allocation7] sm:$0xff] %v164_v49 }
 0x132   :  { %167 = vst [vmem:[#allocation7 + $0x8] sm:$0xff] %v165_v50 }
 0x133   :  { %277 = shalt.err (!%p274_p6)
}
 0x134   :  { %s278_s15 = scalar_lea.hbm %s365_s3, 256 }
 0x135   :  { %p279_p7 = scmp.ne.s32.totalorder %s365_s3, %s278_s15  ;;  %p282_p8 = scmp.lt.u32.totalorder %s278_s15, %s365_s3 }
 0x137   :  { %p284_p9 = pnand %p282_p8, %p279_p7 }
 0x139   :  { %287 = shalt.err (!%p284_p9)
}
 0x13a   :  { %s301_s20 = smov 128   ;;  %s302_s21 = smov 8  }
 0x13b   :  { %179 = dma.vmem_to_hbm [thread:$0]  %s174_s2, 256, %s365_s3, [#allocation4], %s301_s20, %s301_s20, %s302_s21  }
 0x13c   :  { %292 = dma.done.wait [#allocation4], 256  }
 0x13d   :  { %293 = vsyncadd [#allocation4], 4294967040 }
 0x13e   :  { %183 = vsyncpa [#allocation3], 1 }
 0x13f   :  { %184 = vsyncpa [#allocation6], 1 }
 0x140   :  { %185 = vsyncpa [#allocation4], 1 }

// kernel: tpu_custom_call.1
= control target key start
LH: loop header
LB: loop body
LE: loop exit
PB: predicated region body
PF: predicated region fallthrough
CT: control target
= control target key end

     0   :  { %8 = vsyncpa [#allocation3], 0  ;;  %s362_s0 = inlined_call_operand.hbm [shape: bf16[16,32], index: 0, kind: input, shape index: {}]   ;;  %s363_s1 = inlined_call_operand.hbm [shape: bf16[32,128], index: 1, kind: input, shape index: {}]   ;;  %s364_s2 = inlined_call_operand.vmem [shape: f32[1,128], index: 2, kind: input, shape index: {}]   ;;  %s365_s3 = inlined_call_operand.hbm [shape: f32[16,128], index: 3, kind: output, shape index: {}]  }
   0x1   :  { %9 = vsyncpa [#allocation6], 0 }
   0x2   :  { %10 = vsyncpa [#allocation4], 0  ;;  %s294_s12 = smov [#allocation2]   ;;  %s222_s16 = scalar_lea.hbm %s362_s0, 128 }
   0x3   :  { %s16_s13 = sshll.u32 %s294_s12, 4  ;;  %p223_p0 = scmp.ne.s32.totalorder %s362_s0, %s222_s16  ;;  %s17_s13 = int_to_ptr.vmem [resolvable:$true] %s16_s13 }
   0x4   :  { %p226_p1 = scmp.lt.u32.totalorder %s222_s16, %s362_s0 }
   0x6   :  { %p228_p2 = pnand %p226_p1, %p223_p0 }
   0x8   :  { %231 = shalt.err (!%p228_p2)
}
   0x9   :  { %s232_s21 = scalar_lea.vmem %s17_s13, 128  ;;  %p237_p4 = scmp.lt.s32.totalorder %s17_s13, %s17_s13 }
   0xa   :  { %p233_p3 = scmp.ne.s32.totalorder %s17_s13, %s232_s21  ;;  %p238_p5 = scmp.lt.s32.totalorder %s232_s21, %s232_s21 }
   0xc   :  { %p239_p6 = por %p238_p5, %p237_p4 }
   0xe   :  { %p240_p7 = pnand %p239_p6, %p233_p3 }
  0x10   :  { %243 = shalt.err (!%p240_p7)
}
  0x11   :  { %s295_s22 = smov 64   ;;  %s296_s23 = smov 4  }
  0x12   :  { %22 = dma.hbm_to_vmem [thread:$0]  %s362_s0, 128, %s17_s13, [#allocation3], %s295_s22, %s295_s22, %s296_s23  }
  0x13   :  { %s297_s26 = smov [#allocation5]   ;;  %s244_s30 = scalar_lea.hbm %s363_s1, 256 }
  0x14   :  { %s28_s27 = sshll.u32 %s297_s26, 4  ;;  %p245_p8 = scmp.ne.s32.totalorder %s363_s1, %s244_s30  ;;  %s29_s27 = int_to_ptr.vmem [resolvable:$true] %s28_s27 }
  0x15   :  { %p248_p9 = scmp.lt.u32.totalorder %s244_s30, %s363_s1 }
  0x17   :  { %p250_p10 = pnand %p248_p9, %p245_p8 }
  0x19   :  { %253 = shalt.err (!%p250_p10)
}
  0x1a   :  { %s254_s8 = scalar_lea.vmem %s29_s27, 256  ;;  %p259_p12 = scmp.lt.s32.totalorder %s29_s27, %s29_s27 }
  0x1b   :  { %p255_p11 = scmp.ne.s32.totalorder %s29_s27, %s254_s8  ;;  %p260_p13 = scmp.lt.s32.totalorder %s254_s8, %s254_s8 }
  0x1d   :  { %p261_p0 = por %p260_p13, %p259_p12 }
  0x1f   :  { %p262_p1 = pnand %p261_p0, %p255_p11 }
  0x21   :  { %265 = shalt.err (!%p262_p1)
}
  0x22   :  { %34 = dma.hbm_to_vmem [thread:$0]  %s363_s1, 256, %s29_s27, [#allocation6], %s295_s22, %s295_s22, %s296_s23  }
  0x23   :  { %288 = dma.done.wait [#allocation3], 128  }
  0x24   :  { %289 = vsyncadd [#allocation3], 4294967168 }
  0x25   :  { %290 = dma.done.wait [#allocation6], 256  }
  0x26   :  { %291 = vsyncadd [#allocation6], 4294967040  ;;  %v298_v0 = vmov 0.0   ;;  %vm299_vm0 = vmmov 0   ;;  %v211_v1 = vld [vmem:[#allocation5] sm:$0xff]   ;;  %v212_v2 = vld [vmem:[#allocation5 + $0x8] sm:$0xff]   ;;  %v119_v25 = vlaneseq }
  0x27   :  { %194 = vmatprep.subr.bf16.mxu0 %v298_v0  ;;  %198 = vmatprep.mubr.msk.bf16.mxu0 %vm299_vm0, %v298_v0  ;;  %v213_v3 = vld [vmem:[#allocation2] sm:$0xff]   ;;  %vm74_vm1 = vcmask 261120   ;;  %s300_s1 = smov [#allocation7]  }
  0x28   :  { %195 = vmatpush3.bf16.msra.mxu0 %v211_v1  ;;  %v186_v4 = vld [vmem:[%s364_s2] ss:$0 sm:$0xff]  ;;  %v120_v33 = vand.u32 127, %v119_v25  ;;  %s173_s2 = sshll.u32 %s300_s1, 4  ;;  %s174_s2 = int_to_ptr.vmem [resolvable:$true] %s173_s2 }
  0x29   :  { %196 = vmatprep.subr.bf16.mxu0 %v298_v0  ;;  %s266_s12 = scalar_lea.vmem %s174_s2, 256  ;;  %p271_p3 = scmp.lt.s32.totalorder %s174_s2, %s174_s2 }
  0x2a   :  { %vm121_vm5 = vcmp.lt.s32.totalorder %v120_v33, 64  ;;  %p267_p2 = scmp.ne.s32.totalorder %s174_s2, %s266_s12  ;;  %p272_p4 = scmp.lt.s32.totalorder %s266_s12, %s266_s12 }
  0x2c   :  { %197 = vmatpush3.bf16.msra.mxu0 %v212_v2  ;;  %p273_p5 = por %p272_p4, %p271_p3 }
  0x2e   :  { %p274_p6 = pnand %p273_p5, %p267_p2 }
  0x2f   :  { %199 = vmatmul.mubr.msk.bf16.vlgmr.msra.gmra.mrb[0].mxu0 %vm74_vm1, %v213_v3 }
 0x102   :  { %v112_v5 = vpop.f32.mrb[0].mxu0 }
 0x103   :  { %v113_v6 = vadd.f32 %v186_v4, %v112_v5  ;;  %v200_v7 = vpop.f32.mrb[1].mxu0 }
 0x104   :  { %v115_v8 = vpop.f32.mrb[2].mxu0 }
 0x105   :  { %v128_v9 = vand.u32 2147483647, %v113_v6  ;;  %v116_v10 = vadd.f32 %v186_v4, %v115_v8  ;;  %v201_v11 = vpop.f32.mrb[3].mxu0  ;;  %v122_v32 = vmax.f32 %v113_v6, 0.0  ;;  %vm124_vm4 = vcmp.ne.f32.partialorder %v113_v6, %v113_v6 }
 0x107   :  { %v130_v12 = vsub.f32 0.0, %v128_v9  ;;  %v129_v13 = vand.u32 2147483647, %v116_v10  ;;  %v123_v38 = vmax.f32 %v116_v10, 0.0  ;;  %vm125_vm6 = vcmp.ne.f32.partialorder %v116_v10, %v116_v10 }
 0x109   :  { %v132_v14 = vmul.f32 1.442695, %v130_v12  ;;  %v131_v15 = vsub.f32 0.0, %v129_v13 }
 0x10b   :  { %214 = vpow2.f32 %v132_v14  ;;  %v134_v16 = vmul.f32 1.442695, %v131_v15 }
 0x10d   :  { %216 = vpow2.f32 %v134_v16 }
 0x115   :  { %v215_v17 = vpop.eup %214 }
 0x116   :  { %v136_v18 = vadd.f32 1.0, %v215_v17  ;;  %v139_v21 = vmul.f32 -0.5, %v215_v17  ;;  %v142_v24 = vand.u32 2147483647, %v215_v17 }
 0x117   :  { %v217_v19 = vpop.eup %216 }
 0x118   :  { %218 = vlog2.f32 %v136_v18  ;;  %v145_v20 = vadd.f32 1.0, %v217_v19  ;;  %v148_v22 = vmul.f32 -0.5, %v217_v19  ;;  %v140_v23 = vadd.f32 1.0, %v139_v21 }
 0x119   :  { %v151_v28 = vand.u32 2147483647, %v217_v19  ;;  %vm143_vm2 = vcmp.lt.f32.partialorder %v142_v24, 0.0004427343 }
 0x11a   :  { %220 = vlog2.f32 %v145_v20  ;;  %v149_v26 = vadd.f32 1.0, %v148_v22  ;;  %v141_v30 = vmul.f32 %v215_v17, %v140_v23 }
 0x11b   :  { %vm152_vm3 = vcmp.lt.f32.partialorder %v151_v28, 0.0004427343 }
 0x11c   :  { %v150_v36 = vmul.f32 %v217_v19, %v149_v26 }
 0x122   :  { %v219_v27 = vpop.eup %218 }
 0x123   :  { %v138_v29 = vmul.f32 0.6931472, %v219_v27 }
 0x124   :  { %v221_v31 = vpop.eup %220 }
 0x125   :  { %v144_v34 = vsel %vm143_vm2, %v141_v30, %v138_v29  ;;  %v147_v35 = vmul.f32 0.6931472, %v221_v31 }
 0x126   :  { %v154_v37 = vadd.f32 %v144_v34, %v122_v32 }
 0x127   :  { %v153_v39 = vsel %vm152_vm3, %v150_v36, %v147_v35 }
 0x128   :  { %v156_v40 = vsel %vm124_vm4, %v113_v6, %v154_v37  ;;  %v155_v41 = vadd.f32 %v153_v39, %v123_v38 }
 0x129   :  { %v158_v42 = vadd.f32 1e-06, %v156_v40 }
 0x12a   :  { %v157_v43 = vsel %vm125_vm6, %v116_v10, %v155_v41 }
 0x12b   :  { %v159_v44 = vadd.f32 1e-06, %v157_v43  ;;  %v160_v45 = vsel %vm121_vm5, %v113_v6, %v158_v42 }
 0x12c   :  { %v162_v46 = vmax.f32 %v160_v45, 0.0 }
 0x12d   :  { %v161_v47 = vsel %vm121_vm5, %v116_v10, %v159_v44 }
 0x12e   :  { %v163_v48 = vmax.f32 %v161_v47, 0.0  ;;  %v164_v49 = vmin.f32 %v162_v46, 1.0 }
 0x130   :  { %v165_v50 = vmin.f32 %v163_v48, 1.0  ;;  %166 = vst [vmem:[#allocation7] sm:$0xff] %v164_v49 }
 0x132   :  { %167 = vst [vmem:[#allocation7 + $0x8] sm:$0xff] %v165_v50 }
 0x133   :  { %277 = shalt.err (!%p274_p6)
}
 0x134   :  { %s278_s15 = scalar_lea.hbm %s365_s3, 256 }
 0x135   :  { %p279_p7 = scmp.ne.s32.totalorder %s365_s3, %s278_s15  ;;  %p282_p8 = scmp.lt.u32.totalorder %s278_s15, %s365_s3 }
 0x137   :  { %p284_p9 = pnand %p282_p8, %p279_p7 }
 0x139   :  { %287 = shalt.err (!%p284_p9)
}
 0x13a   :  { %s301_s20 = smov 128   ;;  %s302_s21 = smov 8  }
 0x13b   :  { %179 = dma.vmem_to_hbm [thread:$0]  %s174_s2, 256, %s365_s3, [#allocation4], %s301_s20, %s301_s20, %s302_s21  }
 0x13c   :  { %292 = dma.done.wait [#allocation4], 256  }
 0x13d   :  { %293 = vsyncadd [#allocation4], 4294967040 }
 0x13e   :  { %183 = vsyncpa [#allocation3], 1 }
 0x13f   :  { %184 = vsyncpa [#allocation6], 1 }
 0x140   :  { %185 = vsyncpa [#allocation4], 1 }

</bundles_post_ra>
